<compile_context>
chip_gen: v7x
topology: tpu7x:2x2x1
jax: 0.10.0
libtpu: 0.0.40
codegen_flags: <defaults>
</compile_context>

<pallas_src>
import functools

import jax
import jax.numpy as jnp
import numpy as np
from jax.experimental import pallas as pl
from jax.experimental.pallas import tpu as pltpu


# ---------------------------------------------------------------------------
# Sinusoid table (identical values to the PyTorch module's buffer).
# ---------------------------------------------------------------------------
def get_sinusoid_encoding_table(n_position: int, d_hid: int) -> jnp.ndarray:
    """Returns [1, n_position, d_hid] float32."""
    pos = np.arange(n_position, dtype=np.float64)[:, None]               # [P, 1]
    j = np.arange(d_hid, dtype=np.float64)[None, :]                      # [1, D]
    angle = pos / np.power(10000.0, 2.0 * np.floor(j / 2.0) / d_hid)     # [P, D]
    # (pos==0 special case of the reference yields identical values:
    #  sin(0)=0 on even dims, cos(0)=1 on odd dims.)
    table = np.zeros((n_position, d_hid), dtype=np.float64)
    table[:, 0::2] = np.sin(angle[:, 0::2])
    table[:, 1::2] = np.cos(angle[:, 1::2])
    return jnp.asarray(table[None, :, :], dtype=jnp.float32)             # [1, P, D]


# ---------------------------------------------------------------------------
# Kernel: out = x + pe  (pe broadcast over the batch rows of the tile).
# ---------------------------------------------------------------------------
def _add_pe_kernel(x_ref, pe_ref, o_ref):
    # x_ref/o_ref: (b_tile, col_tile); pe_ref: (1, col_tile) broadcast over rows.
    o_ref[...] = (x_ref[...] + pe_ref[...]).astype(o_ref.dtype)


# ---------------------------------------------------------------------------
# Tiling helpers (all static / trace-time Python).
# ---------------------------------------------------------------------------
def _round_up(n: int, m: int) -> int:
    return -(-n // m) * m


def _round_down(n: int, m: int) -> int:
    return (n // m) * m


def _choose_tiles(B: int, LD: int, itemsize: int, target_bytes: int = 4 << 20):
    """Pick (b_tile, col_tile) for a (B, LD) array.

    col_tile: multiple of 128 (or == LD when LD < 128), sized so a tile is
              roughly `target_bytes`.
    b_tile:   multiple of the dtype sublane count, or exactly B.
    Partial last blocks are handled by cdiv grids + masked stores.
    """
    sub = {1: 32, 2: 16}.get(itemsize, 8)  # sublanes per vreg for this dtype

    # Column tile: lane-dense, multiple of 128.
    if LD < 128:
        col_tile = LD  # full last dim (allowed by the (8,128) escape clause)
    else:
        row_base = min(B, sub)
        cap = max(128, _round_down(target_bytes // (row_base * itemsize), 128))
        col_tile = min(cap, _round_down(LD, 128))

    # Row tile: multiple of `sub`, or the whole batch.
    if B <= sub:
        b_tile = B
    else:
        rows = target_bytes // (col_tile * itemsize)
        b_tile = B if rows >= B else max(sub, _round_down(rows, sub))

    # v7x megacore: aim for >= 4 grid steps so both TensorCores get work, but
    # never drop column tiles below 512 lanes (keeps >=85% of HBM roofline).
    n_rows = -(-B // b_tile)
    n_cols = -(-LD // col_tile)
    if n_rows * n_cols < 4 and col_tile % 128 == 0:
        want_cols = -(-4 // n_rows)
        new_col = _round_up(-(-LD // want_cols), 128)
        if 512 <= new_col < col_tile:
            col_tile = new_col

    return b_tile, col_tile


# ---------------------------------------------------------------------------
# Forward pass.  NOTE: x is donated (consumed) — the kernel writes in place.
# ---------------------------------------------------------------------------
@functools.partial(jax.jit, donate_argnums=(0,))
def positional_encoding_forward(x: jnp.ndarray, pos_table: jnp.ndarray) -> jnp.ndarray:
    """x: [B, L, D] (donated); pos_table: [1, n_position, D] float32 buffer."""
    B, L, D = x.shape
    _, P, Dt = pos_table.shape
    if D != Dt:
        raise ValueError(f"hidden dim mismatch: x has {D}, pos_table has {Dt}")
    if L > P:
        raise ValueError(f"sequence length {L} exceeds n_position {P}")

    LD = L * D
    itemsize = x.dtype.itemsize
    x_flat = x.reshape(B, LD)  # contiguous reshape — free

    b_tile, col_tile = _choose_tiles(B, LD, itemsize, target_bytes=4 << 20)

    if col_tile % 128 == 0:
        # Common path: pass the FULL flattened table; the BlockSpec index_map
        # slices column blocks (valid: the needed region starts at offset 0
        # and L <= n_position, so block j of x uses columns j*col_tile.. of pe).
        pe_in = pos_table.reshape(1, P * D).astype(x.dtype)
    else:
        # Tiny LD (< 128): the PE block must equal its full array dims, so
        # slice the needed rows once in the wrapper (negligible traffic).
        pe_in = pos_table[:, :L, :].reshape(1, LD).astype(x.dtype)

    grid = (pl.cdiv(B, b_tile), pl.cdiv(LD, col_tile))

    # Scoped VMEM: double-buffered x-in + out + pe tiles, plus headroom.
    # (Explicit limit so >2 MiB tiles also fit v5e's 16 MiB scoped default.)
    tile_bytes = 2 * (2 * b_tile * col_tile + col_tile) * itemsize + (2 << 20)
    vmem_limit = int(min(max(tile_bytes, 16 << 20), 30 << 20))

    # TODO(synk): for B < 8 a factor of L could be folded into the row axis
    # (with a modulo PE index_map) to fill all 8 sublanes; skipped for clarity.
    out_flat = pl.pallas_call(
        _add_pe_kernel,
        out_shape=jax.ShapeDtypeStruct((B, LD), x.dtype),
        grid_spec=pltpu.PrefetchScalarGridSpec(
            num_scalar_prefetch=0,
            grid=grid,
            in_specs=[
                pl.BlockSpec((b_tile, col_tile), lambda b, j: (b, j)),  # x tile
                pl.BlockSpec((1, col_tile), lambda b, j: (0, j)),       # shared PE tile
            ],
            out_specs=pl.BlockSpec((b_tile, col_tile), lambda b, j: (b, j)),
        ),
        input_output_aliases={0: 0},  # out reuses x's (donated) HBM buffer
        compiler_params=pltpu.CompilerParams(
            dimension_semantics=("parallel", "parallel"),
            vmem_limit_bytes=vmem_limit,
        ),
    )(x_flat, pe_in)

    return out_flat.reshape(B, L, D)


if __name__ == "__main__":
    d_hid = 32
    n_position = 200
    B, L = 2, 8

    pos_table = get_sinusoid_encoding_table(n_position, d_hid)

    key = jax.random.PRNGKey(0)
    x = jax.random.normal(key, (B, L, d_hid), dtype=jnp.float32)

    # Reference computed BEFORE the kernel call: x's buffer is donated to it.
    ref = np.asarray(x + pos_table[:, :L, :])

    out = positional_encoding_forward(x, pos_table)
    out = jax.block_until_ready(out)

    assert out.shape == (B, L, d_hid)
    np.testing.assert_allclose(np.asarray(out), ref, rtol=1e-6, atol=1e-6)

    print("KERNEL_OK")
</pallas_src>

<mosaic_0001>
module attributes {stable_mosaic.version = 11 : i64} {
  func.func @_add_pe_kernel(%arg0: i32, %arg1: i32, %arg2: memref<2x256xf32, #tpu.memory_space<vmem>>, %arg3: memref<1x256xf32, #tpu.memory_space<vmem>>, %arg4: memref<2x256xf32, #tpu.memory_space<vmem>>) attributes {dimension_semantics = [#tpu.dimension_semantics<parallel>, #tpu.dimension_semantics<parallel>], iteration_bounds = array<i64: 1, 1>, scalar_prefetch = 0 : i64, scratch_operands = 0 : i64, tpu.core_type = #tpu.core_type<tc>, window_params = [{transform_indices = @transform_0, window_bounds = array<i64: 2, 256>}, {transform_indices = @transform_1, window_bounds = array<i64: 1, 256>}, {transform_indices = @transform_2, window_bounds = array<i64: 2, 256>}]} {
    %c0 = arith.constant 0 : index
    %c0_0 = arith.constant 0 : index
    %0 = vector.load %arg2[%c0, %c0_0] : memref<2x256xf32, #tpu.memory_space<vmem>>, vector<2x256xf32>
    %c0_1 = arith.constant 0 : index
    %c0_2 = arith.constant 0 : index
    %1 = vector.load %arg3[%c0_1, %c0_2] : memref<1x256xf32, #tpu.memory_space<vmem>>, vector<1x256xf32>
    %2 = vector.broadcast %1 : vector<1x256xf32> to vector<2x256xf32>
    %3 = arith.addf %0, %2 : vector<2x256xf32>
    %c0_3 = arith.constant 0 : index
    %c0_4 = arith.constant 0 : index
    %4 = vector.load %arg4[%c0_3, %c0_4] : memref<2x256xf32, #tpu.memory_space<vmem>>, vector<2x256xf32>
    tpu.vector_store %arg4[%c0_3, %c0_4], %3 {strides = array<i32>} : memref<2x256xf32, #tpu.memory_space<vmem>>, vector<2x256xf32>,
    return
  }
  func.func @transform_0(%arg0: i32, %arg1: i32) -> (i32, i32) {
    %c0_i32 = arith.constant 0 : i32
    return %arg0, %arg1 : i32, i32
  }
  func.func @transform_1(%arg0: i32, %arg1: i32) -> (i32, i32) {
    %c0_i32 = arith.constant 0 : i32
    %c0_i32_0 = arith.constant 0 : i32
    return %c0_i32, %arg1 : i32, i32
  }
  func.func @transform_2(%arg0: i32, %arg1: i32) -> (i32, i32) {
    %c0_i32 = arith.constant 0 : i32
    return %arg0, %arg1 : i32, i32
  }
}

</mosaic_0001>

<bundles_post_ra>
// kernel: positional_encoding_forward.1
= control target key start
LH: loop header
LB: loop body
LE: loop exit
PB: predicated region body
PF: predicated region fallthrough
CT: control target
= control target key end

     0   :  { %v14_v0 = vlaneseq  ;;  %v38_v1 = vmov 1983009808   ;;  %s63_s1 = inlined_call_operand.vmem [shape: f32[1,6400], index: 1, kind: input, shape index: {}]   ;;  %s64_s0 = inlined_call_operand.vmem [shape: f32[2,256], index: 0, kind: input, shape index: {}, may-alias: {0,2}]   ;;  %s65_s2 = inlined_call_operand.vmem [shape: f32[2,256], index: 2, kind: output, shape index: {}, may-alias: {0,2}]  }
   0x1   :  { %v24_v2 = vunpack.c.l.s4 %v38_v1  ;;  %v12_v4 = vld [vmem:[%s63_s1] sm:$0x3] }
   0x2   :  { %v15_v3 = vshrl.u32 %v14_v0, 7  ;;  %v11_v12 = vld [vmem:[%s64_s0] sm:$0xf] }
   0x3   :  { %v25_v5 = vunpack.c.0.s8 %v24_v2 }
   0x4   :  { %v16_v6 = vsub.s32 0, %v15_v3  ;;  %v20_v7 = vsub.s32 1, %v15_v3 }
   0x5   :  { %v28_v10 = vsub.s32 %v25_v5, %v15_v3 }
   0x6   :  { %v17_v8 = vrot.slane %v12_v4, %v16_v6  ;;  %v21_v9 = vrot.slane %v12_v4, %v20_v7 }
   0x8   :  { %v22_v11 = vcombine.low %v17_v8, %v21_v9 }
   0xa   :  { %v29_v13 = vrot.slane %v22_v11, %v28_v10 }
   0xc   :  { %v31_v14 = vadd.f32 %v29_v13, %v11_v12 }
   0xe   :  { %32 = vst [vmem:[%s65_s2] sm:$0xf] %v31_v14 }

</bundles_post_ra>
